<compile_context>
chip_gen: v7x
topology: tpu7x:2x2x1
jax: 0.10.0
libtpu: 0.0.40
codegen_flags: <defaults>
</compile_context>

<pallas_src>
import functools

import jax
import jax.numpy as jnp
import numpy as np
from jax import lax
from jax.experimental import pallas as pl
from jax.experimental.pallas import tpu as pltpu

K = 4          # kernel size
PAD = 1        # reflect padding
EPS = 1e-5     # InstanceNorm2d default eps
NEG_SLOPE = 0.2


def _block_kernel(rp_ref, w_ref, o_ref, acc_ref, *, stride, h_out, w_out):
    """One (batch, C_out-tile) grid step.

    rp_ref : (1, s, H2*Wo, K*C_in)  bf16 row-patches of one batch element;
             padded-input row h = h2*s + hr, last dim ordered (kj, ci).
    w_ref  : (K, TC, K*C_in)        bf16 per-kernel-row weight matrices.
    o_ref  : (1, TC, Ho*Wo)         output tile, HW flattened on the lane axis.
    acc_ref: (TC, Ho*Wo) f32        VMEM scratch accumulator.
    """
    hw = h_out * w_out

    # Convolution = sum over kernel rows ki of a shifted NT matmul on the MXU
    # (bf16 operands, f32 accumulation into the VMEM scratch).
    for ki in range(K):
        h0 = ki // stride          # shift in output-row units along H
        hr = ki % stride           # sub-row within the stride split
        slab = rp_ref[0, hr, h0 * w_out:(h0 + h_out) * w_out, :]   # (HW, K*C_in)
        wk = w_ref[ki]                                             # (TC, K*C_in)
        contrib = lax.dot_general(wk, slab, (((1,), (1,)), ((), ())),
                                  preferred_element_type=jnp.float32)
        if ki == 0:
            acc_ref[...] = contrib
        else:
            acc_ref[...] += contrib

    # InstanceNorm2d (affine=False, biased variance) + LeakyReLU(0.2).
    # Stats from a single read of acc (E[x], E[x^2]); one fused
    # normalize + activation pass; all math in f32.
    acc = acc_ref[...]
    inv_hw = 1.0 / hw
    s1 = jnp.sum(acc, axis=1, keepdims=True)
    s2 = jnp.sum(acc * acc, axis=1, keepdims=True)
    mean = s1 * inv_hw
    var = jnp.maximum(s2 * inv_hw - mean * mean, 0.0)
    scale = lax.rsqrt(var + EPS)
    shift = mean * scale
    y = acc * scale - shift
    o_ref[0] = jnp.where(y >= 0, y, NEG_SLOPE * y).astype(o_ref.dtype)


def _row_patches(xp, stride, h_out, w_out):
    # xp: (N, C, Hc, Wc) reflect-padded (and cropped) input.
    # Returns (N, s, (Hc//s)*Wo, K*C) bf16; last dim ordered (kj, c);
    # padded-input row index h = h2*s + hr with flat index = h2*Wo + ow.
    n, c, hc, _ = xp.shape
    cols = [xp[:, :, :, kj: kj + stride * (w_out - 1) + 1: stride]
            for kj in range(K)]                              # each (N, C, Hc, Wo)
    rp = jnp.stack(cols, axis=0)                             # (K, N, C, Hc, Wo)
    rp = rp.transpose(1, 3, 4, 0, 2)                         # (N, Hc, Wo, K, C)
    rp = rp.reshape(n, hc // stride, stride, w_out, K * c)   # (N, H2, s, Wo, KC)
    rp = rp.transpose(0, 2, 1, 3, 4)                         # (N, s, H2, Wo, KC)
    return rp.reshape(n, stride, (hc // stride) * w_out, K * c).astype(jnp.bfloat16)


def _pick_cout_tile(c_out):
    # 256 matches the native MXU M on v6e/v7x; fall back to smaller divisors.
    for t in (256, 128, 64):
        if c_out >= t and c_out % t == 0:
            return t
    return c_out


@functools.partial(jax.jit, static_argnames=("stride", "out_dtype"))
def block_forward(x, weight, bias, *, stride, out_dtype=None):
    """x: (N, C_in, H, W) NCHW; weight: (C_out, C_in, 4, 4); bias: (C_out,).

    The conv bias is accepted for API parity but unused: InstanceNorm2d
    (affine=False) subtracts the per-channel mean, cancelling it exactly.
    `out_dtype` defaults to x.dtype (module semantics); pass bf16 when the
    consumer is the next bf16 conv to halve the output HBM stream.
    """
    del bias
    assert stride in (1, 2), "CycleGAN Block uses stride 1 or 2"
    n, c_in, h, w = x.shape
    c_out = weight.shape[0]
    out_dtype = x.dtype if out_dtype is None else out_dtype
    h_out = (h + 2 * PAD - K) // stride + 1
    w_out = (w + 2 * PAD - K) // stride + 1
    hw = h_out * w_out
    kc = K * c_in
    hc = stride * (h_out - 1) + K        # padded rows actually used
    wc = stride * (w_out - 1) + K

    xp = jnp.pad(x, ((0, 0), (0, 0), (PAD, PAD), (PAD, PAD)), mode="reflect")
    xp = xp[:, :, :hc, :wc]
    rp = _row_patches(xp, stride, h_out, w_out)      # (N, s, H2*Wo, KC) bf16

    # weight[co, ci, ki, kj] -> w_mat[ki, co, kj*C_in + ci] (matches rp order).
    w_mat = weight.transpose(2, 0, 3, 1).reshape(K, c_out, kc).astype(jnp.bfloat16)

    h2wo = (hc // stride) * w_out
    ct = _pick_cout_tile(c_out)
    n_ct = c_out // ct

    # VMEM budget from the actual double-buffered blocks + scratch (+ slack),
    # floored at 40 MiB, capped at the largest physical VMEM (128 MiB).
    out_itemsize = jnp.dtype(out_dtype).itemsize
    rp_blk = stride * h2wo * kc * 2          # bf16
    w_blk = K * ct * kc * 2                  # bf16
    o_blk = ct * hw * out_itemsize
    acc_blk = ct * hw * 4                    # f32 scratch
    vmem_need = 2 * (rp_blk + w_blk + o_blk) + acc_blk + (4 << 20)
    vmem_limit = int(min(max(vmem_need, 40 << 20), 128 << 20))

    kernel = functools.partial(_block_kernel, stride=stride,
                               h_out=h_out, w_out=w_out)

    out = pl.pallas_call(
        kernel,
        out_shape=jax.ShapeDtypeStruct((n, c_out, hw), out_dtype),
        grid_spec=pltpu.PrefetchScalarGridSpec(
            num_scalar_prefetch=0,
            grid=(n, n_ct),
            in_specs=[
                # rp block depends only on the batch index -> not re-DMA'd
                # across the C_out tile axis.
                pl.BlockSpec((1, stride, h2wo, kc), lambda b, ci: (b, 0, 0, 0)),
                pl.BlockSpec((K, ct, kc), lambda b, ci: (0, ci, 0)),
            ],
            out_specs=pl.BlockSpec((1, ct, hw), lambda b, ci: (b, ci, 0)),
            scratch_shapes=[pltpu.VMEM((ct, hw), jnp.float32)],
        ),
        compiler_params=pltpu.CompilerParams(
            dimension_semantics=("parallel", "parallel"),
            vmem_limit_bytes=vmem_limit,
        ),
    )(rp, w_mat)

    # (N, C_out, HW) -> (N, C_out, Ho, Wo): pure reshape, already NCHW-ordered.
    return out.reshape(n, c_out, h_out, w_out)


def _reference(x, weight, bias, stride):
    # Pure-JAX f32 reference (includes the bias to demonstrate its cancellation).
    xp = jnp.pad(x, ((0, 0), (0, 0), (PAD, PAD), (PAD, PAD)), mode="reflect")
    y = lax.conv_general_dilated(
        xp, weight, window_strides=(stride, stride), padding="VALID",
        dimension_numbers=("NCHW", "OIHW", "NCHW"))
    y = y + bias.reshape(1, -1, 1, 1)
    mean = jnp.mean(y, axis=(2, 3), keepdims=True)
    var = jnp.mean((y - mean) ** 2, axis=(2, 3), keepdims=True)
    yn = (y - mean) * lax.rsqrt(var + EPS)
    return jnp.where(yn >= 0, yn, NEG_SLOPE * yn)


if __name__ == "__main__":
    # Small shapes consistent with the module.
    N, C_IN, C_OUT, H, W, STRIDE = 2, 4, 8, 16, 16, 2

    key = jax.random.PRNGKey(0)
    kx, kw, kb = jax.random.split(key, 3)
    x = jax.random.normal(kx, (N, C_IN, H, W), dtype=jnp.float32)
    fan_in = C_IN * K * K
    weight = jax.random.normal(kw, (C_OUT, C_IN, K, K), dtype=jnp.float32) / np.sqrt(fan_in)
    bias = jax.random.normal(kb, (C_OUT,), dtype=jnp.float32) * 0.1

    out = block_forward(x, weight, bias, stride=STRIDE)
    jax.block_until_ready(out)

    ref = _reference(x, weight, bias, STRIDE)
    np.testing.assert_allclose(np.asarray(out), np.asarray(ref),
                               rtol=3e-2, atol=3e-2)
    print("KERNEL_OK")
</pallas_src>

<mosaic_0001>
module attributes {stable_mosaic.version = 11 : i64} {
  func.func @_block_kernel(%arg0: i32, %arg1: i32, %arg2: memref<1x2x72x16xbf16, #tpu.memory_space<vmem>>, %arg3: memref<4x8x16xbf16, #tpu.memory_space<vmem>>, %arg4: memref<1x8x64xf32, #tpu.memory_space<vmem>>, %arg5: memref<8x64xf32, #tpu.memory_space<vmem>>) attributes {dimension_semantics = [#tpu.dimension_semantics<parallel>, #tpu.dimension_semantics<parallel>], iteration_bounds = array<i64: 2, 1>, scalar_prefetch = 0 : i64, scratch_operands = 1 : i64, tpu.core_type = #tpu.core_type<tc>, window_params = [{transform_indices = @transform_0, window_bounds = array<i64: 1, 2, 72, 16>}, {transform_indices = @transform_1, window_bounds = array<i64: 4, 8, 16>}, {transform_indices = @transform_2, window_bounds = array<i64: 1, 8, 64>}]} {
    %c0 = arith.constant 0 : index
    %c0_0 = arith.constant 0 : index
    %c0_1 = arith.constant 0 : index
    %c0_2 = arith.constant 0 : index
    %0 = vector.load %arg2[%c0, %c0_0, %c0_1, %c0_2] : memref<1x2x72x16xbf16, #tpu.memory_space<vmem>>, vector<1x1x64x16xbf16>
    %1 = vector.shape_cast %0 : vector<1x1x64x16xbf16> to vector<64x16xbf16>
    %c0_3 = arith.constant 0 : index
    %c0_4 = arith.constant 0 : index
    %c0_5 = arith.constant 0 : index
    %2 = vector.load %arg3[%c0_3, %c0_4, %c0_5] : memref<4x8x16xbf16, #tpu.memory_space<vmem>>, vector<1x8x16xbf16>
    %3 = vector.shape_cast %2 : vector<1x8x16xbf16> to vector<8x16xbf16>
    %cst = arith.constant dense<0.000000e+00> : vector<8x64xf32>
    %4 = tpu.matmul %3, %1, %cst {dimension_numbers = #tpu.dot_dimension_numbers<[1], [1], [0], [0], [0, 0, 1, 0], [], []>} : vector<8x16xbf16>, vector<64x16xbf16>, vector<8x64xf32> -> vector<8x64xf32>
    %c0_6 = arith.constant 0 : index
    %c0_7 = arith.constant 0 : index
    %5 = vector.load %arg5[%c0_6, %c0_7] : memref<8x64xf32, #tpu.memory_space<vmem>>, vector<8x64xf32>
    tpu.vector_store %arg5[%c0_6, %c0_7], %4 {strides = array<i32>} : memref<8x64xf32, #tpu.memory_space<vmem>>, vector<8x64xf32>,
    %c0_8 = arith.constant 0 : index
    %c1 = arith.constant 1 : index
    %c0_9 = arith.constant 0 : index
    %c0_10 = arith.constant 0 : index
    %6 = vector.load %arg2[%c0_8, %c1, %c0_9, %c0_10] : memref<1x2x72x16xbf16, #tpu.memory_space<vmem>>, vector<1x1x64x16xbf16>
    %7 = vector.shape_cast %6 : vector<1x1x64x16xbf16> to vector<64x16xbf16>
    %c1_11 = arith.constant 1 : index
    %c0_12 = arith.constant 0 : index
    %c0_13 = arith.constant 0 : index
    %8 = vector.load %arg3[%c1_11, %c0_12, %c0_13] : memref<4x8x16xbf16, #tpu.memory_space<vmem>>, vector<1x8x16xbf16>
    %9 = vector.shape_cast %8 : vector<1x8x16xbf16> to vector<8x16xbf16>
    %cst_14 = arith.constant dense<0.000000e+00> : vector<8x64xf32>
    %10 = tpu.matmul %9, %7, %cst_14 {dimension_numbers = #tpu.dot_dimension_numbers<[1], [1], [0], [0], [0, 0, 1, 0], [], []>} : vector<8x16xbf16>, vector<64x16xbf16>, vector<8x64xf32> -> vector<8x64xf32>
    %c0_15 = arith.constant 0 : index
    %c0_16 = arith.constant 0 : index
    %11 = vector.load %arg5[%c0_15, %c0_16] : memref<8x64xf32, #tpu.memory_space<vmem>>, vector<8x64xf32>
    %12 = arith.addf %11, %10 : vector<8x64xf32>
    %c0_17 = arith.constant 0 : index
    %c0_18 = arith.constant 0 : index
    %13 = vector.load %arg5[%c0_17, %c0_18] : memref<8x64xf32, #tpu.memory_space<vmem>>, vector<8x64xf32>
    tpu.vector_store %arg5[%c0_17, %c0_18], %12 {strides = array<i32>} : memref<8x64xf32, #tpu.memory_space<vmem>>, vector<8x64xf32>,
    %c0_19 = arith.constant 0 : index
    %c0_20 = arith.constant 0 : index
    %c8 = arith.constant 8 : index
    %c0_21 = arith.constant 0 : index
    %14 = vector.load %arg2[%c0_19, %c0_20, %c8, %c0_21] : memref<1x2x72x16xbf16, #tpu.memory_space<vmem>>, vector<1x1x64x16xbf16>
    %15 = vector.shape_cast %14 : vector<1x1x64x16xbf16> to vector<64x16xbf16>
    %c2 = arith.constant 2 : index
    %c0_22 = arith.constant 0 : index
    %c0_23 = arith.constant 0 : index
    %16 = vector.load %arg3[%c2, %c0_22, %c0_23] : memref<4x8x16xbf16, #tpu.memory_space<vmem>>, vector<1x8x16xbf16>
    %17 = vector.shape_cast %16 : vector<1x8x16xbf16> to vector<8x16xbf16>
    %cst_24 = arith.constant dense<0.000000e+00> : vector<8x64xf32>
    %18 = tpu.matmul %17, %15, %cst_24 {dimension_numbers = #tpu.dot_dimension_numbers<[1], [1], [0], [0], [0, 0, 1, 0], [], []>} : vector<8x16xbf16>, vector<64x16xbf16>, vector<8x64xf32> -> vector<8x64xf32>
    %c0_25 = arith.constant 0 : index
    %c0_26 = arith.constant 0 : index
    %19 = vector.load %arg5[%c0_25, %c0_26] : memref<8x64xf32, #tpu.memory_space<vmem>>, vector<8x64xf32>
    %20 = arith.addf %19, %18 : vector<8x64xf32>
    %c0_27 = arith.constant 0 : index
    %c0_28 = arith.constant 0 : index
    %21 = vector.load %arg5[%c0_27, %c0_28] : memref<8x64xf32, #tpu.memory_space<vmem>>, vector<8x64xf32>
    tpu.vector_store %arg5[%c0_27, %c0_28], %20 {strides = array<i32>} : memref<8x64xf32, #tpu.memory_space<vmem>>, vector<8x64xf32>,
    %c0_29 = arith.constant 0 : index
    %c1_30 = arith.constant 1 : index
    %c8_31 = arith.constant 8 : index
    %c0_32 = arith.constant 0 : index
    %22 = vector.load %arg2[%c0_29, %c1_30, %c8_31, %c0_32] : memref<1x2x72x16xbf16, #tpu.memory_space<vmem>>, vector<1x1x64x16xbf16>
    %23 = vector.shape_cast %22 : vector<1x1x64x16xbf16> to vector<64x16xbf16>
    %c3 = arith.constant 3 : index
    %c0_33 = arith.constant 0 : index
    %c0_34 = arith.constant 0 : index
    %24 = vector.load %arg3[%c3, %c0_33, %c0_34] : memref<4x8x16xbf16, #tpu.memory_space<vmem>>, vector<1x8x16xbf16>
    %25 = vector.shape_cast %24 : vector<1x8x16xbf16> to vector<8x16xbf16>
    %cst_35 = arith.constant dense<0.000000e+00> : vector<8x64xf32>
    %26 = tpu.matmul %25, %23, %cst_35 {dimension_numbers = #tpu.dot_dimension_numbers<[1], [1], [0], [0], [0, 0, 1, 0], [], []>} : vector<8x16xbf16>, vector<64x16xbf16>, vector<8x64xf32> -> vector<8x64xf32>
    %c0_36 = arith.constant 0 : index
    %c0_37 = arith.constant 0 : index
    %27 = vector.load %arg5[%c0_36, %c0_37] : memref<8x64xf32, #tpu.memory_space<vmem>>, vector<8x64xf32>
    %28 = arith.addf %27, %26 : vector<8x64xf32>
    %c0_38 = arith.constant 0 : index
    %c0_39 = arith.constant 0 : index
    %29 = vector.load %arg5[%c0_38, %c0_39] : memref<8x64xf32, #tpu.memory_space<vmem>>, vector<8x64xf32>
    tpu.vector_store %arg5[%c0_38, %c0_39], %28 {strides = array<i32>} : memref<8x64xf32, #tpu.memory_space<vmem>>, vector<8x64xf32>,
    %c0_40 = arith.constant 0 : index
    %c0_41 = arith.constant 0 : index
    %30 = vector.load %arg5[%c0_40, %c0_41] : memref<8x64xf32, #tpu.memory_space<vmem>>, vector<8x64xf32>
    %cst_42 = arith.constant dense<0.000000e+00> : vector<8xf32>
    %31 = vector.multi_reduction <add>, %30, %cst_42 [1] : vector<8x64xf32> to vector<8xf32>
    %32 = vector.shape_cast %31 : vector<8xf32> to vector<8x1xf32>
    %33 = arith.mulf %30, %30 : vector<8x64xf32>
    %cst_43 = arith.constant dense<0.000000e+00> : vector<8xf32>
    %34 = vector.multi_reduction <add>, %33, %cst_43 [1] : vector<8x64xf32> to vector<8xf32>
    %35 = vector.shape_cast %34 : vector<8xf32> to vector<8x1xf32>
    %cst_44 = arith.constant 1.562500e-02 : f32
    %36 = vector.broadcast %cst_44 : f32 to vector<8x1xf32>
    %37 = arith.mulf %32, %36 : vector<8x1xf32>
    %cst_45 = arith.constant 1.562500e-02 : f32
    %38 = vector.broadcast %cst_45 : f32 to vector<8x1xf32>
    %39 = arith.mulf %35, %38 : vector<8x1xf32>
    %40 = arith.mulf %37, %37 : vector<8x1xf32>
    %41 = arith.subf %39, %40 : vector<8x1xf32>
    %cst_46 = arith.constant 0.000000e+00 : f32
    %42 = vector.broadcast %cst_46 : f32 to vector<8x1xf32>
    %43 = arith.maximumf %41, %42 : vector<8x1xf32>
    %cst_47 = arith.constant 9.99999974E-6 : f32
    %44 = vector.broadcast %cst_47 : f32 to vector<8x1xf32>
    %45 = arith.addf %43, %44 : vector<8x1xf32>
    %46 = math.rsqrt %45 : vector<8x1xf32>
    %47 = arith.mulf %37, %46 : vector<8x1xf32>
    %48 = vector.broadcast %46 : vector<8x1xf32> to vector<8x64xf32>
    %49 = arith.mulf %30, %48 : vector<8x64xf32>
    %50 = vector.broadcast %47 : vector<8x1xf32> to vector<8x64xf32>
    %51 = arith.subf %49, %50 : vector<8x64xf32>
    %cst_48 = arith.constant 0.000000e+00 : f32
    %52 = vector.broadcast %cst_48 : f32 to vector<8x64xf32>
    %53 = arith.cmpf oge, %51, %52 : vector<8x64xf32>
    %cst_49 = arith.constant 2.000000e-01 : f32
    %54 = vector.broadcast %cst_49 : f32 to vector<8x64xf32>
    %55 = arith.mulf %54, %51 : vector<8x64xf32>
    %56 = arith.select %53, %51, %55 : vector<8x64xi1>, vector<8x64xf32>
    %c0_50 = arith.constant 0 : index
    %c0_51 = arith.constant 0 : index
    %c0_52 = arith.constant 0 : index
    %57 = vector.load %arg4[%c0_50, %c0_51, %c0_52] : memref<1x8x64xf32, #tpu.memory_space<vmem>>, vector<1x8x64xf32>
    %58 = vector.shape_cast %57 : vector<1x8x64xf32> to vector<8x64xf32>
    %59 = vector.shape_cast %56 : vector<8x64xf32> to vector<1x8x64xf32>
    tpu.vector_store %arg4[%c0_50, %c0_51, %c0_52], %59 {strides = array<i32>} : memref<1x8x64xf32, #tpu.memory_space<vmem>>, vector<1x8x64xf32>,
    return
  }
  func.func @transform_0(%arg0: i32, %arg1: i32) -> (i32, i32, i32, i32) {
    %c0_i32 = arith.constant 0 : i32
    %c0_i32_0 = arith.constant 0 : i32
    %c0_i32_1 = arith.constant 0 : i32
    %c0_i32_2 = arith.constant 0 : i32
    return %arg0, %c0_i32, %c0_i32_0, %c0_i32_1 : i32, i32, i32, i32
  }
  func.func @transform_1(%arg0: i32, %arg1: i32) -> (i32, i32, i32) {
    %c0_i32 = arith.constant 0 : i32
    %c0_i32_0 = arith.constant 0 : i32
    %c0_i32_1 = arith.constant 0 : i32
    return %c0_i32, %arg1, %c0_i32_0 : i32, i32, i32
  }
  func.func @transform_2(%arg0: i32, %arg1: i32) -> (i32, i32, i32) {
    %c0_i32 = arith.constant 0 : i32
    %c0_i32_0 = arith.constant 0 : i32
    return %arg0, %arg1, %c0_i32 : i32, i32, i32
  }
}

</mosaic_0001>

<bundles_post_ra>
// kernel: block_forward.1
= control target key start
LH: loop header
LB: loop body
LE: loop exit
PB: predicated region body
PF: predicated region fallthrough
CT: control target
= control target key end

     0   :  { %s844_s9 = smov 0   ;;  %s846_s10 = smov 0   ;;  %s962_s0 = inlined_call_operand.vmem [shape: bf16[2,2,72,16], index: 0, kind: input, shape index: {}]   ;;  %s963_s1 = inlined_call_operand.vmem [shape: bf16[4,8,16], index: 1, kind: input, shape index: {}]   ;;  %s964_s2 = inlined_call_operand.vmem [shape: f32[2,8,64], index: 2, kind: output, shape index: {}]  }
   0x1   :  { %s848_s11 = smov 0  }
   0x2 LB: > { %s24_s12 = sadd.s32 1, %s821_s10  ;;  %p646_p0 = scmp.ge.s32.totalorder %s825_s11, 1  ;;  %s825_s11 = sphi %s848_s11, %s12_s11   ;;  %s821_s10 = sphi %s846_s10, %s966_s10   ;;  %s817_s9 = sphi %s844_s9, %s965_s9  }
   0x3   : > { %p26_p1 = scmp.ge.s32.totalorder %s24_s12, 2  ;;  %p135_p2 = scmp.lt.s32.totalorder %s825_s11, 3 }
   0x5   : > { %s968_s12 = smov (%p26_p1, %s24_s12), 0  ;;  %p136_p3 = pnand %p646_p0, %p135_p2 }
   0x6   : > { %p163_p4 = scmp.lt.s32.totalorder (!%p136_p3), %s817_s9, 1  ;;  %v827_v0 = vmov (!%p136_p3), 0.0   ;;  %vm828_vm0 = vmmov (!%p136_p3), 0   ;;  %vm209_vm1 = vcmask (!%p136_p3), 130048   ;;  %v188_v19 = vld [vmem:[%s963_s1] sm:$0xf] (!%p136_p3) }
   0x7   : > { %139 = sbr.rel (%p136_p3) target bundleno = 489 (0x1e9), region = 28  ;;  %710 = vmatprep.subr.bf16.mxu0 (!%p136_p3), %v827_v0  ;;  %722 = vmatprep.subr.bf16.mxu1 (!%p136_p3), %v827_v0  ;;  %v662_v21 = vld [vmem:[%s963_s1 + $0x4] sm:$0xf] (!%p136_p3)  ;;  %v668_v35 = vld [vmem:[%s963_s1 + $0x8] sm:$0xf] (!%p136_p3)  ;;  %vm265_vm2 = vcmask (!%p136_p3), 523264  }
   0x8   : > { %718 = vmatprep.mubr.msk.bf16.mxu0 (!%p136_p3), %vm828_vm0, %v827_v0  ;;  %730 = vmatprep.mubr.msk.bf16.mxu1 (!%p136_p3), %vm828_vm0, %v827_v0  ;;  %v682_v36 = vld [vmem:[%s963_s1 + $0xc] sm:$0xf] (!%p136_p3) }
   0xe   : > { %s970_s9 = smov (!%p163_p4, %s817_s9), 1 }
   0xf   : > { %s758_s13 = smul.u32 72, %s970_s9  ;;  %s648_s25 = sshll.u32 %s970_s9, 3 }
  0x10   : > { %s178_s28 = scalar_lea.vmem %s964_s2, %s648_s25 }
  0x11   : > { %s874_s16 = scalar_lea.vmem %s962_s0, %s758_s13 }
  0x12   : > { %v785_v1 = vld [vmem:[%s874_s16] sm:$0xff]   ;;  %v787_v5 = vld [vmem:[%s874_s16 + $0x8] sm:$0xff]   ;;  %v789_v9 = vld [vmem:[%s874_s16 + $0x10] sm:$0xff]  }
  0x13   : > { %v786_v2 = vld [vmem:[%s874_s16 + $0x24] sm:$0xff]   ;;  %v214_v3 = vsel %vm209_vm1, %v785_v1, 0  ;;  %v788_v6 = vld [vmem:[%s874_s16 + $0x2c] sm:$0xff]   ;;  %v217_v7 = vsel %vm209_vm1, %v787_v5, 0  ;;  %v790_v10 = vld [vmem:[%s874_s16 + $0x34] sm:$0xff]   ;;  %v220_v11 = vsel %vm209_vm1, %v789_v9, 0 }
  0x14   : > { %711 = vmatpush3.bf16.xpose.msra.mxu0 %v214_v3  ;;  %v302_v4 = vsel %vm209_vm1, %v786_v2, 0  ;;  %v305_v8 = vsel %vm209_vm1, %v788_v6, 0  ;;  %v308_v12 = vsel %vm209_vm1, %v790_v10, 0  ;;  %v791_v13 = vld [vmem:[%s874_s16 + $0x18] sm:$0xff]   ;;  %v793_v17 = vld [vmem:[%s874_s16 + $0x4] sm:$0xff]   ;;  %v795_v23 = vld [vmem:[%s874_s16 + $0xc] sm:$0xff]  }
  0x15   : > { %712 = vmatprep.subr.bf16.mxu0 %v827_v0  ;;  %723 = vmatpush3.bf16.xpose.msra.mxu1 %v302_v4  ;;  %v792_v14 = vld [vmem:[%s874_s16 + $0x3c] sm:$0xff]   ;;  %v223_v15 = vsel %vm209_vm1, %v791_v13, 0  ;;  %v794_v18 = vld [vmem:[%s874_s16 + $0x28] sm:$0xff]   ;;  %v390_v20 = vsel %vm209_vm1, %v793_v17, 0  ;;  %v796_v24 = vld [vmem:[%s874_s16 + $0x30] sm:$0xff]   ;;  %v393_v25 = vsel %vm209_vm1, %v795_v23, 0 }
  0x16   : > { %724 = vmatprep.subr.bf16.mxu1 %v827_v0  ;;  %v311_v16 = vsel %vm209_vm1, %v792_v14, 0  ;;  %v478_v22 = vsel %vm209_vm1, %v794_v18, 0  ;;  %v481_v26 = vsel %vm209_vm1, %v796_v24, 0  ;;  %v797_v27 = vld [vmem:[%s874_s16 + $0x14] sm:$0xff]   ;;  %v799_v31 = vld [vmem:[%s874_s16 + $0x1c] sm:$0xff]  }
  0x17   : > { %v798_v28 = vld [vmem:[%s874_s16 + $0x38] sm:$0xff]   ;;  %v396_v29 = vsel %vm209_vm1, %v797_v27, 0  ;;  %v800_v32 = vld [vmem:[%s874_s16 + $0x40] sm:$0xff]   ;;  %v399_v33 = vsel %vm209_vm1, %v799_v31, 0 }
  0x18   : > { %v484_v30 = vsel %vm209_vm1, %v798_v28, 0  ;;  %v487_v34 = vsel %vm209_vm1, %v800_v32, 0 }
  0x1c   : > { %713 = vmatpush3.bf16.xpose.msra.mxu0 %v217_v7 }
  0x1d   : > { %714 = vmatprep.subr.bf16.mxu0 %v827_v0  ;;  %725 = vmatpush3.bf16.xpose.msra.mxu1 %v305_v8 }
  0x1e   : > { %726 = vmatprep.subr.bf16.mxu1 %v827_v0 }
  0x24   : > { %715 = vmatpush3.bf16.xpose.msra.mxu0 %v220_v11 }
  0x25   : > { %716 = vmatprep.subr.bf16.mxu0 %v827_v0  ;;  %727 = vmatpush3.bf16.xpose.msra.mxu1 %v308_v12 }
  0x26   : > { %728 = vmatprep.subr.bf16.mxu1 %v827_v0 }
  0x2c   : > { %717 = vmatpush3.bf16.xpose.msra.mxu0 %v223_v15 }
  0x2d   : > { %729 = vmatpush3.bf16.xpose.msra.mxu1 %v311_v16  ;;  %734 = vmatprep.subr.bf16.mxu0 %v827_v0 }
  0x2e   : > { %746 = vmatprep.subr.bf16.mxu1 %v827_v0 }
  0x33   : > { %719 = vmatmul.mubr.msk.bf16.vlgmr.msra.gmra.mrb[0].mxu0 %vm209_vm1, %v188_v19 }
  0x34   : > { %735 = vmatpush3.bf16.xpose.msra.mxu0 %v390_v20  ;;  %731 = vmatmul.mubr.msk.bf16.vlgmr.msra.gmra.mrb[0].mxu1 %vm209_vm1, %v662_v21 }
  0x35   : > { %736 = vmatprep.subr.bf16.mxu0 %v827_v0  ;;  %747 = vmatpush3.bf16.xpose.msra.mxu1 %v478_v22 }
  0x36   : > { %748 = vmatprep.subr.bf16.mxu1 %v827_v0  ;;  %742 = vmatprep.mubr.msk.bf16.mxu0 %vm828_vm0, %v827_v0 }
  0x37   : > { %754 = vmatprep.mubr.msk.bf16.mxu1 %vm828_vm0, %v827_v0 }
  0x3c   : > { %737 = vmatpush3.bf16.xpose.msra.mxu0 %v393_v25 }
  0x3d   : > { %738 = vmatprep.subr.bf16.mxu0 %v827_v0  ;;  %749 = vmatpush3.bf16.xpose.msra.mxu1 %v481_v26 }
  0x3e   : > { %750 = vmatprep.subr.bf16.mxu1 %v827_v0 }
  0x44   : > { %739 = vmatpush3.bf16.xpose.msra.mxu0 %v396_v29 }
  0x45   : > { %740 = vmatprep.subr.bf16.mxu0 %v827_v0  ;;  %751 = vmatpush3.bf16.xpose.msra.mxu1 %v484_v30 }
  0x46   : > { %752 = vmatprep.subr.bf16.mxu1 %v827_v0 }
  0x4c   : > { %741 = vmatpush3.bf16.xpose.msra.mxu0 %v399_v33 }
  0x4d   : > { %753 = vmatpush3.bf16.xpose.msra.mxu1 %v487_v34 }
  0x53   : > { %743 = vmatmul.mubr.msk.bf16.vlgmr.msra.gmra.mrb[4].mxu0 %vm209_vm1, %v668_v35 }
  0x54   : > { %755 = vmatmul.mubr.msk.bf16.vlgmr.msra.gmra.mrb[4].mxu1 %vm209_vm1, %v682_v36 }
 0x106   : > { %v259_v37 = vpop.f32.mrb[0].mxu0 }
 0x107   : > { %266 = vst.msk [vmem:[#allocation2] sm:$0xff] %vm265_vm2, %v259_v37  ;;  %v720_v38 = vpop.f32.mrb[1].mxu0  ;;  %v347_v39 = vpop.f32.mrb[0].mxu1 }
 0x108   : > { %v262_v40 = vpop.f32.mrb[2].mxu0  ;;  %v732_v41 = vpop.f32.mrb[1].mxu1 }
 0x109   : > { %v721_v42 = vpop.f32.mrb[3].mxu0  ;;  %v350_v43 = vpop.f32.mrb[2].mxu1 }
 0x10a   : > { %v733_v44 = vpop.f32.mrb[3].mxu1 }
 0x10e   : > { %v353_v45 = vld [vmem:[#allocation2] sm:$0xff] }
 0x10f   : > { %v354_v46 = vadd.f32 %v353_v45, %v347_v39 }
 0x111   : > { %355 = vst.msk [vmem:[#allocation2] sm:$0xff] %vm265_vm2, %v354_v46 }
 0x118   : > { %v441_v48 = vld [vmem:[#allocation2] sm:$0xff] }
 0x126   : > { %v435_v47 = vpop.f32.mrb[4].mxu0 }
 0x127   : > { %v442_v49 = vadd.f32 %v441_v48, %v435_v47  ;;  %v744_v50 = vpop.f32.mrb[5].mxu0  ;;  %v523_v51 = vpop.f32.mrb[4].mxu1 }
 0x128   : > { %v438_v52 = vpop.f32.mrb[6].mxu0  ;;  %v756_v53 = vpop.f32.mrb[5].mxu1 }
 0x129   : > { %443 = vst.msk [vmem:[#allocation2] sm:$0xff] %vm265_vm2, %v442_v49  ;;  %v745_v54 = vpop.f32.mrb[7].mxu0  ;;  %v526_v55 = vpop.f32.mrb[6].mxu1 }
 0x12a   : > { %v757_v56 = vpop.f32.mrb[7].mxu1 }
 0x130   : > { %v529_v57 = vld [vmem:[#allocation2] sm:$0xff] }
 0x131   : > { %v530_v58 = vadd.f32 %v529_v57, %v523_v51 }
 0x133   : > { %531 = vst.msk [vmem:[#allocation2] sm:$0xff] %vm265_vm2, %v530_v58 }
 0x13a   : > { %v532_v59 = vld [vmem:[#allocation2] sm:$0xff] }
 0x13b   : > { %v533_v60 = vsel %vm265_vm2, %v532_v59, 0.0  ;;  %v536_v61 = vmul.f32 %v532_v59, %v532_v59 }
 0x13c   : > { %534 = vadd.xlane.f32.xlu0 %v533_v60 }
 0x13d   : > { %v537_v62 = vsel %vm265_vm2, %v536_v61, 0.0 }
 0x140   : > { %538 = vadd.xlane.f32.xlu0 %v537_v62 }
 0x1c9   : > { %v535_v63 = vpop.xlane.xlu0 %534 }
 0x1ca   : > { %v540_v0 = vmul.f32 0.015625, %v535_v63 }
 0x1cc   : > { %v542_v2 = vmul.f32 %v540_v0, %v540_v0 }
 0x1cd   : > { %v539_v1 = vpop.xlane.xlu0 %538 }
 0x1ce   : > { %v541_v3 = vmul.f32 0.015625, %v539_v1 }
 0x1d0   : > { %v543_v4 = vsub.f32 %v541_v3, %v542_v2 }
 0x1d2   : > { %v544_v5 = vmax.f32 %v543_v4, 0.0 }
 0x1d4   : > { %v545_v6 = vadd.f32 1e-05, %v544_v5 }
 0x1d6   : > { %801 = vrsqrt.f32 %v545_v6 }
 0x1e0   : > { %v802_v7 = vpop.eup %801 }
 0x1e1   : > { %v547_v8 = vmul.f32 %v802_v7, %v540_v0  ;;  %v548_v9 = vmul.f32 %v802_v7, %v532_v59 }
 0x1e3   : > { %v549_v10 = vsub.f32 %v548_v9, %v547_v8 }
 0x1e5   : > { %vm550_vm3 = vcmp.ge.f32.partialorder %v549_v10, 0.0  ;;  %v551_v11 = vmul.f32 0.2, %v549_v10 }
 0x1e7   : > { %v552_v12 = vsel %vm550_vm3, %v549_v10, %v551_v11 }
 0x1e8   : > { %553 = vst.msk [vmem:[%s178_s28] sm:$0xff] %vm265_vm2, %v552_v12 }
 0x1e9 PF: > { %s12_s11 = sadd.s32 1, %s825_s11   ;;  %s965_s9 = smov %s821_s10 }
 0x1ea   : > { %p9_p5 = scmp.ge.s32.totalorder %s12_s11, 4   ;;  %s966_s10 = smov %s968_s12 }
 0x1ec   :  { %11 = sbr.rel (!%p9_p5) target bundleno = 2 (0x2), region = 65 }

</bundles_post_ra>
